<compile_context>
chip_gen: v7x
topology: tpu7x:2x2x1
jax: 0.10.0
libtpu: 0.0.40
codegen_flags: <defaults>
</compile_context>

<pallas_src>
import functools
import math

import jax
import jax.numpy as jnp
from jax import lax
from jax.experimental import pallas as pl
from jax.experimental.pallas import tpu as pltpu


def _token_embedding_kernel(tok_ref, table_ref, o_ref, buf, sems, *,
                            tok_block, scale, unroll):
    """Gather tok_block embedding rows per step with double-buffered row DMAs."""
    oc = pl.program_id(0)            # outer ("parallel") range -> v7x core split
    i = pl.program_id(1)             # inner ("arbitrary") step within the range
    n_inner = pl.num_programs(1)
    chunk = oc * n_inner + i
    slot = i % 2

    def issue(chunk_idx, slot_idx):
        base = chunk_idx * tok_block

        def body(j, carry):
            tok = tok_ref[base + j]                       # scalar id from SMEM
            pltpu.make_async_copy(table_ref.at[tok],      # one embedding row
                                  buf.at[slot_idx, j],
                                  sems.at[slot_idx]).start()
            return carry

        lax.fori_loop(0, tok_block, body, 0, unroll=unroll)

    # Prime the pipeline with this core's first chunk.
    @pl.when(i == 0)
    def _():
        issue(chunk, slot)

    # Prefetch the next chunk into the other slot before waiting on this one.
    @pl.when(i + 1 < n_inner)
    def _():
        issue(chunk + 1, (i + 1) % 2)

    # Aggregate wait: every row copy of this chunk signalled sems[slot]; a single
    # slab-sized descriptor waits for all tok_block * D * itemsize bytes at once.
    pltpu.make_async_copy(buf.at[slot], buf.at[slot], sems.at[slot]).wait()

    # One lane-dense (tok_block, D) store with the sqrt(d_model) scale fused in.
    o_ref[...] = (buf[slot] * scale).astype(o_ref.dtype)


def _round_up(x, m):
    return ((x + m - 1) // m) * m


def token_embedding(tokens, table, *, tok_block=None, force_hbm_table=False):
    """tokens: (B, S) int, table: (V, D) -> (B, S, D) = table[tokens] * sqrt(D)."""
    B, S = tokens.shape
    V, D = table.shape
    N = B * S
    dtype = table.dtype
    itemsize = jnp.dtype(dtype).itemsize
    sublane = max(8, 32 // itemsize)            # 8 (f32) / 16 (bf16) / 32 (int8)
    scale = math.sqrt(float(D))

    # Small-table fast path: keep the whole table resident in VMEM so row gathers are
    # local VMEM->VMEM copies instead of per-row HBM transactions.
    table_bytes = V * D * itemsize
    table_in_vmem = (table_bytes <= 4 * 1024 * 1024) and not force_hbm_table

    if tok_block is None:
        # Big chunks amortize the ~0.35us per-step grid overhead and keep many row
        # DMAs in flight; cap each gather slab at ~6 MiB (double-buffered slabs +
        # double-buffered output block stay well under v7x's 64 MiB VMEM).
        per_slab_budget = 6 * 1024 * 1024
        tok_block = min(512, max(1, per_slab_budget // max(1, D * itemsize)))
        tok_block = max(sublane, (tok_block // sublane) * sublane)
        tok_block = min(tok_block, _round_up(N, sublane))
        # Keep >= 2 chunks so the outer "parallel" axis can feed both v7x cores.
        half = (((N + 1) // 2) // sublane) * sublane
        if half >= sublane:
            tok_block = min(tok_block, half)
    else:
        tok_block = max(sublane, _round_up(tok_block, sublane))

    n_chunks = pl.cdiv(N, tok_block)
    n_pad = n_chunks * tok_block

    flat = tokens.reshape(N).astype(jnp.int32)          # PyTorch does tokens.long()
    if n_pad != N:
        # Only the cheap id vector is padded (token 0); the output stays exactly
        # (N, D) and Pallas drops stores to the ragged tail of the last block.
        flat = jnp.pad(flat, (0, n_pad - N))
    # TODO(synk): for very long token streams (B*S >~ 100K ids) stage ids per-chunk
    # into SMEM via DMA instead of scalar-prefetching the whole stream.

    # Split chunks across two cores (v7x megacore) when they divide evenly; the inner
    # axis stays "arbitrary" so cross-step double buffering remains legal.
    n_outer = 2 if (n_chunks % 2 == 0 and n_chunks >= 2) else 1
    n_inner = n_chunks // n_outer

    if table_in_vmem:
        # Constant index map -> table fetched into VMEM once and reused every step.
        table_spec = pl.BlockSpec((V, D), lambda oc, i, tok: (0, 0))
    else:
        table_spec = pl.BlockSpec(memory_space=pl.ANY)  # table stays in HBM

    out_spec = pl.BlockSpec((tok_block, D), lambda oc, i, tok: (oc * n_inner + i, 0))

    kernel = functools.partial(_token_embedding_kernel, tok_block=tok_block,
                               scale=scale, unroll=min(8, tok_block))

    slab_bytes = tok_block * D * itemsize
    vmem_need = 4 * slab_bytes + (2 * table_bytes if table_in_vmem else 0)
    vmem_limit = min(max(32 * 1024 * 1024, vmem_need + (2 << 20)), 64 * 1024 * 1024)

    out = pl.pallas_call(
        kernel,
        out_shape=jax.ShapeDtypeStruct((N, D), dtype),
        grid_spec=pltpu.PrefetchScalarGridSpec(
            num_scalar_prefetch=1,                      # token ids -> SMEM
            grid=(n_outer, n_inner),
            in_specs=[table_spec],
            out_specs=out_spec,
            scratch_shapes=[
                pltpu.VMEM((2, tok_block, D), dtype),   # double-buffered gather slab
                pltpu.SemaphoreType.DMA((2,)),          # one aggregate sem per slot
            ],
        ),
        compiler_params=pltpu.CompilerParams(
            dimension_semantics=("parallel", "arbitrary"),
            vmem_limit_bytes=vmem_limit,
        ),
        cost_estimate=pl.CostEstimate(
            flops=N * D,                                # the fused scale multiply
            transcendentals=0,
            bytes_accessed=2 * N * D * itemsize + n_pad * 4
            + (table_bytes if table_in_vmem else 0),
        ),
    )(flat, table)

    return out.reshape(B, S, D)


def token_embedding_ref(tokens, table):
    """Pure-JAX reference mirroring the PyTorch forward."""
    D = table.shape[1]
    return table[tokens.astype(jnp.int32)] * math.sqrt(float(D))


if __name__ == "__main__":
    key = jax.random.PRNGKey(0)
    k_tok, k_tab = jax.random.split(key)

    vocab_size, d_model = 1000, 128
    table = 0.02 * jax.random.normal(k_tab, (vocab_size, d_model), jnp.float32)

    def check(tokens, **kw):
        out = jax.block_until_ready(token_embedding(tokens, table, **kw))
        ref = token_embedding_ref(tokens, table)
        assert out.shape == ref.shape, (out.shape, ref.shape)
        assert jnp.allclose(out, ref, atol=1e-6, rtol=1e-6), f"mismatch vs ref {kw}"

    # Small demo shape (B=2, S=8): VMEM-resident-table fast path + HBM gather path.
    tokens_small = jax.random.randint(k_tok, (2, 8), 0, vocab_size, dtype=jnp.int32)
    check(tokens_small)                                # small-table VMEM fast path
    check(tokens_small, force_hbm_table=True)          # HBM row-gather path

    # Longer stream: exercises multi-step inner axis (prime + prefetch + slot reuse)
    # and the 2-core-friendly (parallel, arbitrary) grid split.
    tokens_long = jax.random.randint(jax.random.PRNGKey(1), (4, 128), 0, vocab_size,
                                     dtype=jnp.int32)
    check(tokens_long, tok_block=64)
    check(tokens_long, tok_block=64, force_hbm_table=True)

    # Ragged tail: N=21 not a multiple of tok_block; output stays exactly (B, S, D).
    tokens_ragged = jax.random.randint(jax.random.PRNGKey(2), (3, 7), 0, vocab_size,
                                       dtype=jnp.int32)
    check(tokens_ragged, tok_block=16, force_hbm_table=True)

    print("KERNEL_OK")
</pallas_src>

<mosaic_0001>
module attributes {stable_mosaic.version = 11 : i64} {
  func.func @_token_embedding_kernel(%arg0: i32, %arg1: i32, %arg2: memref<16xi32, #tpu.memory_space<smem>>, %arg3: memref<1000x128xf32, #tpu.memory_space<vmem>>, %arg4: memref<8x128xf32, #tpu.memory_space<vmem>>, %arg5: memref<2x8x128xf32, #tpu.memory_space<vmem>>, %arg6: memref<2x!tpu.dma_semaphore, #tpu.memory_space<semaphore_mem>>) attributes {dimension_semantics = [#tpu.dimension_semantics<parallel>, #tpu.dimension_semantics<arbitrary>], iteration_bounds = array<i64: 2, 1>, scalar_prefetch = 1 : i64, scratch_operands = 2 : i64, tpu.core_type = #tpu.core_type<tc>, window_params = [{pipeline_mode = #tpu.pipeline_mode<synchronous>, transform_indices = @transform_0, window_bounds = array<i64: 1000, 128>}, {transform_indices = @transform_1, window_bounds = array<i64: 8, 128>}]} {
    %c1_i32 = arith.constant 1 : i32
    %0 = arith.muli %arg0, %c1_i32 : i32
    %1 = arith.addi %0, %arg1 : i32
    %c2_i32 = arith.constant 2 : i32
    %c0_i32 = arith.constant 0 : i32
    %2 = arith.cmpi eq, %c2_i32, %c0_i32 : i32
    %c1_i32_0 = arith.constant 1 : i32
    %3 = arith.select %2, %c1_i32_0, %c2_i32 : i32
    %4 = arith.remsi %arg1, %3 : i32
    %c0_i32_1 = arith.constant 0 : i32
    %5 = arith.cmpi ne, %4, %c0_i32_1 : i32
    %c0_i32_2 = arith.constant 0 : i32
    %6 = arith.cmpi slt, %4, %c0_i32_2 : i32
    %c0_i32_3 = arith.constant 0 : i32
    %7 = arith.cmpi slt, %3, %c0_i32_3 : i32
    %8 = arith.xori %6, %7 : i1
    %9 = arith.andi %8, %5 : i1
    %10 = arith.addi %4, %3 : i32
    %11 = arith.select %9, %10, %4 : i32
    %c0_i32_4 = arith.constant 0 : i32
    %12 = arith.cmpi eq, %arg1, %c0_i32_4 : i32
    %13 = arith.extui %12 : i1 to i32
    %c0_i32_5 = arith.constant 0 : i32
    %14 = arith.cmpi ne, %13, %c0_i32_5 : i32
    scf.if %14 {
      %c8_i32 = arith.constant 8 : i32
      %31 = arith.muli %1, %c8_i32 : i32
      %c0_i32_16 = arith.constant 0 : i32
      %32 = arith.addi %31, %c0_i32_16 : i32
      %33 = arith.index_cast %32 : i32 to index
      %34 = memref.load %arg2[%33] : memref<16xi32, #tpu.memory_space<smem>>
      %c0_i32_17 = arith.constant 0 : i32
      %35 = tpu.memref_slice %arg3[%34, %c0_i32_17] : memref<1000x128xf32, #tpu.memory_space<vmem>> -> memref<1x128xf32, #tpu.memory_space<vmem>>
      %36 = tpu.memref_squeeze %35 : memref<1x128xf32, #tpu.memory_space<vmem>> -> memref<128xf32, #tpu.memory_space<vmem>>
      %c0_i32_18 = arith.constant 0 : i32
      %37 = tpu.memref_slice %arg5[%11, %c0_i32_16, %c0_i32_18] : memref<2x8x128xf32, #tpu.memory_space<vmem>> -> memref<1x1x128xf32, #tpu.memory_space<vmem>>
      %38 = tpu.memref_squeeze %37 : memref<1x1x128xf32, #tpu.memory_space<vmem>> -> memref<128xf32, #tpu.memory_space<vmem>>
      %39 = tpu.memref_slice %arg6[%11] : memref<2x!tpu.dma_semaphore, #tpu.memory_space<semaphore_mem>> -> memref<1x!tpu.dma_semaphore, #tpu.memory_space<semaphore_mem>>
      %40 = tpu.memref_squeeze %39 : memref<1x!tpu.dma_semaphore, #tpu.memory_space<semaphore_mem>> -> memref<!tpu.dma_semaphore, #tpu.memory_space<semaphore_mem>>
      tpu.enqueue_dma source(%36 : memref<128xf32, #tpu.memory_space<vmem>>) target(%38 : memref<128xf32, #tpu.memory_space<vmem>>) target_semaphore(%40 : memref<!tpu.dma_semaphore, #tpu.memory_space<semaphore_mem>>)
      %c1_i32_19 = arith.constant 1 : i32
      %41 = arith.addi %31, %c1_i32_19 : i32
      %42 = arith.index_cast %41 : i32 to index
      %43 = memref.load %arg2[%42] : memref<16xi32, #tpu.memory_space<smem>>
      %c0_i32_20 = arith.constant 0 : i32
      %44 = tpu.memref_slice %arg3[%43, %c0_i32_20] : memref<1000x128xf32, #tpu.memory_space<vmem>> -> memref<1x128xf32, #tpu.memory_space<vmem>>
      %45 = tpu.memref_squeeze %44 : memref<1x128xf32, #tpu.memory_space<vmem>> -> memref<128xf32, #tpu.memory_space<vmem>>
      %c0_i32_21 = arith.constant 0 : i32
      %46 = tpu.memref_slice %arg5[%11, %c1_i32_19, %c0_i32_21] : memref<2x8x128xf32, #tpu.memory_space<vmem>> -> memref<1x1x128xf32, #tpu.memory_space<vmem>>
      %47 = tpu.memref_squeeze %46 : memref<1x1x128xf32, #tpu.memory_space<vmem>> -> memref<128xf32, #tpu.memory_space<vmem>>
      %48 = tpu.memref_slice %arg6[%11] : memref<2x!tpu.dma_semaphore, #tpu.memory_space<semaphore_mem>> -> memref<1x!tpu.dma_semaphore, #tpu.memory_space<semaphore_mem>>
      %49 = tpu.memref_squeeze %48 : memref<1x!tpu.dma_semaphore, #tpu.memory_space<semaphore_mem>> -> memref<!tpu.dma_semaphore, #tpu.memory_space<semaphore_mem>>
      tpu.enqueue_dma source(%45 : memref<128xf32, #tpu.memory_space<vmem>>) target(%47 : memref<128xf32, #tpu.memory_space<vmem>>) target_semaphore(%49 : memref<!tpu.dma_semaphore, #tpu.memory_space<semaphore_mem>>)
      %c2_i32_22 = arith.constant 2 : i32
      %50 = arith.addi %31, %c2_i32_22 : i32
      %51 = arith.index_cast %50 : i32 to index
      %52 = memref.load %arg2[%51] : memref<16xi32, #tpu.memory_space<smem>>
      %c0_i32_23 = arith.constant 0 : i32
      %53 = tpu.memref_slice %arg3[%52, %c0_i32_23] : memref<1000x128xf32, #tpu.memory_space<vmem>> -> memref<1x128xf32, #tpu.memory_space<vmem>>
      %54 = tpu.memref_squeeze %53 : memref<1x128xf32, #tpu.memory_space<vmem>> -> memref<128xf32, #tpu.memory_space<vmem>>
      %c0_i32_24 = arith.constant 0 : i32
      %55 = tpu.memref_slice %arg5[%11, %c2_i32_22, %c0_i32_24] : memref<2x8x128xf32, #tpu.memory_space<vmem>> -> memref<1x1x128xf32, #tpu.memory_space<vmem>>
      %56 = tpu.memref_squeeze %55 : memref<1x1x128xf32, #tpu.memory_space<vmem>> -> memref<128xf32, #tpu.memory_space<vmem>>
      %57 = tpu.memref_slice %arg6[%11] : memref<2x!tpu.dma_semaphore, #tpu.memory_space<semaphore_mem>> -> memref<1x!tpu.dma_semaphore, #tpu.memory_space<semaphore_mem>>
      %58 = tpu.memref_squeeze %57 : memref<1x!tpu.dma_semaphore, #tpu.memory_space<semaphore_mem>> -> memref<!tpu.dma_semaphore, #tpu.memory_space<semaphore_mem>>
      tpu.enqueue_dma source(%54 : memref<128xf32, #tpu.memory_space<vmem>>) target(%56 : memref<128xf32, #tpu.memory_space<vmem>>) target_semaphore(%58 : memref<!tpu.dma_semaphore, #tpu.memory_space<semaphore_mem>>)
      %c3_i32 = arith.constant 3 : i32
      %59 = arith.addi %31, %c3_i32 : i32
      %60 = arith.index_cast %59 : i32 to index
      %61 = memref.load %arg2[%60] : memref<16xi32, #tpu.memory_space<smem>>
      %c0_i32_25 = arith.constant 0 : i32
      %62 = tpu.memref_slice %arg3[%61, %c0_i32_25] : memref<1000x128xf32, #tpu.memory_space<vmem>> -> memref<1x128xf32, #tpu.memory_space<vmem>>
      %63 = tpu.memref_squeeze %62 : memref<1x128xf32, #tpu.memory_space<vmem>> -> memref<128xf32, #tpu.memory_space<vmem>>
      %c0_i32_26 = arith.constant 0 : i32
      %64 = tpu.memref_slice %arg5[%11, %c3_i32, %c0_i32_26] : memref<2x8x128xf32, #tpu.memory_space<vmem>> -> memref<1x1x128xf32, #tpu.memory_space<vmem>>
      %65 = tpu.memref_squeeze %64 : memref<1x1x128xf32, #tpu.memory_space<vmem>> -> memref<128xf32, #tpu.memory_space<vmem>>
      %66 = tpu.memref_slice %arg6[%11] : memref<2x!tpu.dma_semaphore, #tpu.memory_space<semaphore_mem>> -> memref<1x!tpu.dma_semaphore, #tpu.memory_space<semaphore_mem>>
      %67 = tpu.memref_squeeze %66 : memref<1x!tpu.dma_semaphore, #tpu.memory_space<semaphore_mem>> -> memref<!tpu.dma_semaphore, #tpu.memory_space<semaphore_mem>>
      tpu.enqueue_dma source(%63 : memref<128xf32, #tpu.memory_space<vmem>>) target(%65 : memref<128xf32, #tpu.memory_space<vmem>>) target_semaphore(%67 : memref<!tpu.dma_semaphore, #tpu.memory_space<semaphore_mem>>)
      %c4_i32 = arith.constant 4 : i32
      %68 = arith.addi %31, %c4_i32 : i32
      %69 = arith.index_cast %68 : i32 to index
      %70 = memref.load %arg2[%69] : memref<16xi32, #tpu.memory_space<smem>>
      %c0_i32_27 = arith.constant 0 : i32
      %71 = tpu.memref_slice %arg3[%70, %c0_i32_27] : memref<1000x128xf32, #tpu.memory_space<vmem>> -> memref<1x128xf32, #tpu.memory_space<vmem>>
      %72 = tpu.memref_squeeze %71 : memref<1x128xf32, #tpu.memory_space<vmem>> -> memref<128xf32, #tpu.memory_space<vmem>>
      %c0_i32_28 = arith.constant 0 : i32
      %73 = tpu.memref_slice %arg5[%11, %c4_i32, %c0_i32_28] : memref<2x8x128xf32, #tpu.memory_space<vmem>> -> memref<1x1x128xf32, #tpu.memory_space<vmem>>
      %74 = tpu.memref_squeeze %73 : memref<1x1x128xf32, #tpu.memory_space<vmem>> -> memref<128xf32, #tpu.memory_space<vmem>>
      %75 = tpu.memref_slice %arg6[%11] : memref<2x!tpu.dma_semaphore, #tpu.memory_space<semaphore_mem>> -> memref<1x!tpu.dma_semaphore, #tpu.memory_space<semaphore_mem>>
      %76 = tpu.memref_squeeze %75 : memref<1x!tpu.dma_semaphore, #tpu.memory_space<semaphore_mem>> -> memref<!tpu.dma_semaphore, #tpu.memory_space<semaphore_mem>>
      tpu.enqueue_dma source(%72 : memref<128xf32, #tpu.memory_space<vmem>>) target(%74 : memref<128xf32, #tpu.memory_space<vmem>>) target_semaphore(%76 : memref<!tpu.dma_semaphore, #tpu.memory_space<semaphore_mem>>)
      %c5_i32 = arith.constant 5 : i32
      %77 = arith.addi %31, %c5_i32 : i32
      %78 = arith.index_cast %77 : i32 to index
      %79 = memref.load %arg2[%78] : memref<16xi32, #tpu.memory_space<smem>>
      %c0_i32_29 = arith.constant 0 : i32
      %80 = tpu.memref_slice %arg3[%79, %c0_i32_29] : memref<1000x128xf32, #tpu.memory_space<vmem>> -> memref<1x128xf32, #tpu.memory_space<vmem>>
      %81 = tpu.memref_squeeze %80 : memref<1x128xf32, #tpu.memory_space<vmem>> -> memref<128xf32, #tpu.memory_space<vmem>>
      %c0_i32_30 = arith.constant 0 : i32
      %82 = tpu.memref_slice %arg5[%11, %c5_i32, %c0_i32_30] : memref<2x8x128xf32, #tpu.memory_space<vmem>> -> memref<1x1x128xf32, #tpu.memory_space<vmem>>
      %83 = tpu.memref_squeeze %82 : memref<1x1x128xf32, #tpu.memory_space<vmem>> -> memref<128xf32, #tpu.memory_space<vmem>>
      %84 = tpu.memref_slice %arg6[%11] : memref<2x!tpu.dma_semaphore, #tpu.memory_space<semaphore_mem>> -> memref<1x!tpu.dma_semaphore, #tpu.memory_space<semaphore_mem>>
      %85 = tpu.memref_squeeze %84 : memref<1x!tpu.dma_semaphore, #tpu.memory_space<semaphore_mem>> -> memref<!tpu.dma_semaphore, #tpu.memory_space<semaphore_mem>>
      tpu.enqueue_dma source(%81 : memref<128xf32, #tpu.memory_space<vmem>>) target(%83 : memref<128xf32, #tpu.memory_space<vmem>>) target_semaphore(%85 : memref<!tpu.dma_semaphore, #tpu.memory_space<semaphore_mem>>)
      %c6_i32 = arith.constant 6 : i32
      %86 = arith.addi %31, %c6_i32 : i32
      %87 = arith.index_cast %86 : i32 to index
      %88 = memref.load %arg2[%87] : memref<16xi32, #tpu.memory_space<smem>>
      %c0_i32_31 = arith.constant 0 : i32
      %89 = tpu.memref_slice %arg3[%88, %c0_i32_31] : memref<1000x128xf32, #tpu.memory_space<vmem>> -> memref<1x128xf32, #tpu.memory_space<vmem>>
      %90 = tpu.memref_squeeze %89 : memref<1x128xf32, #tpu.memory_space<vmem>> -> memref<128xf32, #tpu.memory_space<vmem>>
      %c0_i32_32 = arith.constant 0 : i32
      %91 = tpu.memref_slice %arg5[%11, %c6_i32, %c0_i32_32] : memref<2x8x128xf32, #tpu.memory_space<vmem>> -> memref<1x1x128xf32, #tpu.memory_space<vmem>>
      %92 = tpu.memref_squeeze %91 : memref<1x1x128xf32, #tpu.memory_space<vmem>> -> memref<128xf32, #tpu.memory_space<vmem>>
      %93 = tpu.memref_slice %arg6[%11] : memref<2x!tpu.dma_semaphore, #tpu.memory_space<semaphore_mem>> -> memref<1x!tpu.dma_semaphore, #tpu.memory_space<semaphore_mem>>
      %94 = tpu.memref_squeeze %93 : memref<1x!tpu.dma_semaphore, #tpu.memory_space<semaphore_mem>> -> memref<!tpu.dma_semaphore, #tpu.memory_space<semaphore_mem>>
      tpu.enqueue_dma source(%90 : memref<128xf32, #tpu.memory_space<vmem>>) target(%92 : memref<128xf32, #tpu.memory_space<vmem>>) target_semaphore(%94 : memref<!tpu.dma_semaphore, #tpu.memory_space<semaphore_mem>>)
      %c7_i32 = arith.constant 7 : i32
      %95 = arith.addi %31, %c7_i32 : i32
      %96 = arith.index_cast %95 : i32 to index
      %97 = memref.load %arg2[%96] : memref<16xi32, #tpu.memory_space<smem>>
      %c0_i32_33 = arith.constant 0 : i32
      %98 = tpu.memref_slice %arg3[%97, %c0_i32_33] : memref<1000x128xf32, #tpu.memory_space<vmem>> -> memref<1x128xf32, #tpu.memory_space<vmem>>
      %99 = tpu.memref_squeeze %98 : memref<1x128xf32, #tpu.memory_space<vmem>> -> memref<128xf32, #tpu.memory_space<vmem>>
      %c0_i32_34 = arith.constant 0 : i32
      %100 = tpu.memref_slice %arg5[%11, %c7_i32, %c0_i32_34] : memref<2x8x128xf32, #tpu.memory_space<vmem>> -> memref<1x1x128xf32, #tpu.memory_space<vmem>>
      %101 = tpu.memref_squeeze %100 : memref<1x1x128xf32, #tpu.memory_space<vmem>> -> memref<128xf32, #tpu.memory_space<vmem>>
      %102 = tpu.memref_slice %arg6[%11] : memref<2x!tpu.dma_semaphore, #tpu.memory_space<semaphore_mem>> -> memref<1x!tpu.dma_semaphore, #tpu.memory_space<semaphore_mem>>
      %103 = tpu.memref_squeeze %102 : memref<1x!tpu.dma_semaphore, #tpu.memory_space<semaphore_mem>> -> memref<!tpu.dma_semaphore, #tpu.memory_space<semaphore_mem>>
      tpu.enqueue_dma source(%99 : memref<128xf32, #tpu.memory_space<vmem>>) target(%101 : memref<128xf32, #tpu.memory_space<vmem>>) target_semaphore(%103 : memref<!tpu.dma_semaphore, #tpu.memory_space<semaphore_mem>>)
      %c8_i32_35 = arith.constant 8 : i32
    } else {
    }
    %c1_i32_6 = arith.constant 1 : i32
    %15 = arith.addi %arg1, %c1_i32_6 : i32
    %c1_i32_7 = arith.constant 1 : i32
    %16 = arith.cmpi slt, %15, %c1_i32_7 : i32
    %17 = arith.extui %16 : i1 to i32
    %c0_i32_8 = arith.constant 0 : i32
    %18 = arith.cmpi ne, %17, %c0_i32_8 : i32
    scf.if %18 {
      %c1_i32_16 = arith.constant 1 : i32
      %31 = arith.addi %1, %c1_i32_16 : i32
      %c1_i32_17 = arith.constant 1 : i32
      %32 = arith.addi %arg1, %c1_i32_17 : i32
      %c2_i32_18 = arith.constant 2 : i32
      %c0_i32_19 = arith.constant 0 : i32
      %33 = arith.cmpi eq, %c2_i32_18, %c0_i32_19 : i32
      %c1_i32_20 = arith.constant 1 : i32
      %34 = arith.select %33, %c1_i32_20, %c2_i32_18 : i32
      %35 = arith.remsi %32, %34 : i32
      %c0_i32_21 = arith.constant 0 : i32
      %36 = arith.cmpi ne, %35, %c0_i32_21 : i32
      %c0_i32_22 = arith.constant 0 : i32
      %37 = arith.cmpi slt, %35, %c0_i32_22 : i32
      %c0_i32_23 = arith.constant 0 : i32
      %38 = arith.cmpi slt, %34, %c0_i32_23 : i32
      %39 = arith.xori %37, %38 : i1
      %40 = arith.andi %39, %36 : i1
      %41 = arith.addi %35, %34 : i32
      %42 = arith.select %40, %41, %35 : i32
      %c8_i32 = arith.constant 8 : i32
      %43 = arith.muli %31, %c8_i32 : i32
      %c0_i32_24 = arith.constant 0 : i32
      %44 = arith.addi %43, %c0_i32_24 : i32
      %45 = arith.index_cast %44 : i32 to index
      %46 = memref.load %arg2[%45] : memref<16xi32, #tpu.memory_space<smem>>
      %c0_i32_25 = arith.constant 0 : i32
      %47 = tpu.memref_slice %arg3[%46, %c0_i32_25] : memref<1000x128xf32, #tpu.memory_space<vmem>> -> memref<1x128xf32, #tpu.memory_space<vmem>>
      %48 = tpu.memref_squeeze %47 : memref<1x128xf32, #tpu.memory_space<vmem>> -> memref<128xf32, #tpu.memory_space<vmem>>
      %c0_i32_26 = arith.constant 0 : i32
      %49 = tpu.memref_slice %arg5[%42, %c0_i32_24, %c0_i32_26] : memref<2x8x128xf32, #tpu.memory_space<vmem>> -> memref<1x1x128xf32, #tpu.memory_space<vmem>>
      %50 = tpu.memref_squeeze %49 : memref<1x1x128xf32, #tpu.memory_space<vmem>> -> memref<128xf32, #tpu.memory_space<vmem>>
      %51 = tpu.memref_slice %arg6[%42] : memref<2x!tpu.dma_semaphore, #tpu.memory_space<semaphore_mem>> -> memref<1x!tpu.dma_semaphore, #tpu.memory_space<semaphore_mem>>
      %52 = tpu.memref_squeeze %51 : memref<1x!tpu.dma_semaphore, #tpu.memory_space<semaphore_mem>> -> memref<!tpu.dma_semaphore, #tpu.memory_space<semaphore_mem>>
      tpu.enqueue_dma source(%48 : memref<128xf32, #tpu.memory_space<vmem>>) target(%50 : memref<128xf32, #tpu.memory_space<vmem>>) target_semaphore(%52 : memref<!tpu.dma_semaphore, #tpu.memory_space<semaphore_mem>>)
      %c1_i32_27 = arith.constant 1 : i32
      %53 = arith.addi %43, %c1_i32_27 : i32
      %54 = arith.index_cast %53 : i32 to index
      %55 = memref.load %arg2[%54] : memref<16xi32, #tpu.memory_space<smem>>
      %c0_i32_28 = arith.constant 0 : i32
      %56 = tpu.memref_slice %arg3[%55, %c0_i32_28] : memref<1000x128xf32, #tpu.memory_space<vmem>> -> memref<1x128xf32, #tpu.memory_space<vmem>>
      %57 = tpu.memref_squeeze %56 : memref<1x128xf32, #tpu.memory_space<vmem>> -> memref<128xf32, #tpu.memory_space<vmem>>
      %c0_i32_29 = arith.constant 0 : i32
      %58 = tpu.memref_slice %arg5[%42, %c1_i32_27, %c0_i32_29] : memref<2x8x128xf32, #tpu.memory_space<vmem>> -> memref<1x1x128xf32, #tpu.memory_space<vmem>>
      %59 = tpu.memref_squeeze %58 : memref<1x1x128xf32, #tpu.memory_space<vmem>> -> memref<128xf32, #tpu.memory_space<vmem>>
      %60 = tpu.memref_slice %arg6[%42] : memref<2x!tpu.dma_semaphore, #tpu.memory_space<semaphore_mem>> -> memref<1x!tpu.dma_semaphore, #tpu.memory_space<semaphore_mem>>
      %61 = tpu.memref_squeeze %60 : memref<1x!tpu.dma_semaphore, #tpu.memory_space<semaphore_mem>> -> memref<!tpu.dma_semaphore, #tpu.memory_space<semaphore_mem>>
      tpu.enqueue_dma source(%57 : memref<128xf32, #tpu.memory_space<vmem>>) target(%59 : memref<128xf32, #tpu.memory_space<vmem>>) target_semaphore(%61 : memref<!tpu.dma_semaphore, #tpu.memory_space<semaphore_mem>>)
      %c2_i32_30 = arith.constant 2 : i32
      %62 = arith.addi %43, %c2_i32_30 : i32
      %63 = arith.index_cast %62 : i32 to index
      %64 = memref.load %arg2[%63] : memref<16xi32, #tpu.memory_space<smem>>
      %c0_i32_31 = arith.constant 0 : i32
      %65 = tpu.memref_slice %arg3[%64, %c0_i32_31] : memref<1000x128xf32, #tpu.memory_space<vmem>> -> memref<1x128xf32, #tpu.memory_space<vmem>>
      %66 = tpu.memref_squeeze %65 : memref<1x128xf32, #tpu.memory_space<vmem>> -> memref<128xf32, #tpu.memory_space<vmem>>
      %c0_i32_32 = arith.constant 0 : i32
      %67 = tpu.memref_slice %arg5[%42, %c2_i32_30, %c0_i32_32] : memref<2x8x128xf32, #tpu.memory_space<vmem>> -> memref<1x1x128xf32, #tpu.memory_space<vmem>>
      %68 = tpu.memref_squeeze %67 : memref<1x1x128xf32, #tpu.memory_space<vmem>> -> memref<128xf32, #tpu.memory_space<vmem>>
      %69 = tpu.memref_slice %arg6[%42] : memref<2x!tpu.dma_semaphore, #tpu.memory_space<semaphore_mem>> -> memref<1x!tpu.dma_semaphore, #tpu.memory_space<semaphore_mem>>
      %70 = tpu.memref_squeeze %69 : memref<1x!tpu.dma_semaphore, #tpu.memory_space<semaphore_mem>> -> memref<!tpu.dma_semaphore, #tpu.memory_space<semaphore_mem>>
      tpu.enqueue_dma source(%66 : memref<128xf32, #tpu.memory_space<vmem>>) target(%68 : memref<128xf32, #tpu.memory_space<vmem>>) target_semaphore(%70 : memref<!tpu.dma_semaphore, #tpu.memory_space<semaphore_mem>>)
      %c3_i32 = arith.constant 3 : i32
      %71 = arith.addi %43, %c3_i32 : i32
      %72 = arith.index_cast %71 : i32 to index
      %73 = memref.load %arg2[%72] : memref<16xi32, #tpu.memory_space<smem>>
      %c0_i32_33 = arith.constant 0 : i32
      %74 = tpu.memref_slice %arg3[%73, %c0_i32_33] : memref<1000x128xf32, #tpu.memory_space<vmem>> -> memref<1x128xf32, #tpu.memory_space<vmem>>
      %75 = tpu.memref_squeeze %74 : memref<1x128xf32, #tpu.memory_space<vmem>> -> memref<128xf32, #tpu.memory_space<vmem>>
      %c0_i32_34 = arith.constant 0 : i32
      %76 = tpu.memref_slice %arg5[%42, %c3_i32, %c0_i32_34] : memref<2x8x128xf32, #tpu.memory_space<vmem>> -> memref<1x1x128xf32, #tpu.memory_space<vmem>>
      %77 = tpu.memref_squeeze %76 : memref<1x1x128xf32, #tpu.memory_space<vmem>> -> memref<128xf32, #tpu.memory_space<vmem>>
      %78 = tpu.memref_slice %arg6[%42] : memref<2x!tpu.dma_semaphore, #tpu.memory_space<semaphore_mem>> -> memref<1x!tpu.dma_semaphore, #tpu.memory_space<semaphore_mem>>
      %79 = tpu.memref_squeeze %78 : memref<1x!tpu.dma_semaphore, #tpu.memory_space<semaphore_mem>> -> memref<!tpu.dma_semaphore, #tpu.memory_space<semaphore_mem>>
      tpu.enqueue_dma source(%75 : memref<128xf32, #tpu.memory_space<vmem>>) target(%77 : memref<128xf32, #tpu.memory_space<vmem>>) target_semaphore(%79 : memref<!tpu.dma_semaphore, #tpu.memory_space<semaphore_mem>>)
      %c4_i32 = arith.constant 4 : i32
      %80 = arith.addi %43, %c4_i32 : i32
      %81 = arith.index_cast %80 : i32 to index
      %82 = memref.load %arg2[%81] : memref<16xi32, #tpu.memory_space<smem>>
      %c0_i32_35 = arith.constant 0 : i32
      %83 = tpu.memref_slice %arg3[%82, %c0_i32_35] : memref<1000x128xf32, #tpu.memory_space<vmem>> -> memref<1x128xf32, #tpu.memory_space<vmem>>
      %84 = tpu.memref_squeeze %83 : memref<1x128xf32, #tpu.memory_space<vmem>> -> memref<128xf32, #tpu.memory_space<vmem>>
      %c0_i32_36 = arith.constant 0 : i32
      %85 = tpu.memref_slice %arg5[%42, %c4_i32, %c0_i32_36] : memref<2x8x128xf32, #tpu.memory_space<vmem>> -> memref<1x1x128xf32, #tpu.memory_space<vmem>>
      %86 = tpu.memref_squeeze %85 : memref<1x1x128xf32, #tpu.memory_space<vmem>> -> memref<128xf32, #tpu.memory_space<vmem>>
      %87 = tpu.memref_slice %arg6[%42] : memref<2x!tpu.dma_semaphore, #tpu.memory_space<semaphore_mem>> -> memref<1x!tpu.dma_semaphore, #tpu.memory_space<semaphore_mem>>
      %88 = tpu.memref_squeeze %87 : memref<1x!tpu.dma_semaphore, #tpu.memory_space<semaphore_mem>> -> memref<!tpu.dma_semaphore, #tpu.memory_space<semaphore_mem>>
      tpu.enqueue_dma source(%84 : memref<128xf32, #tpu.memory_space<vmem>>) target(%86 : memref<128xf32, #tpu.memory_space<vmem>>) target_semaphore(%88 : memref<!tpu.dma_semaphore, #tpu.memory_space<semaphore_mem>>)
      %c5_i32 = arith.constant 5 : i32
      %89 = arith.addi %43, %c5_i32 : i32
      %90 = arith.index_cast %89 : i32 to index
      %91 = memref.load %arg2[%90] : memref<16xi32, #tpu.memory_space<smem>>
      %c0_i32_37 = arith.constant 0 : i32
      %92 = tpu.memref_slice %arg3[%91, %c0_i32_37] : memref<1000x128xf32, #tpu.memory_space<vmem>> -> memref<1x128xf32, #tpu.memory_space<vmem>>
      %93 = tpu.memref_squeeze %92 : memref<1x128xf32, #tpu.memory_space<vmem>> -> memref<128xf32, #tpu.memory_space<vmem>>
      %c0_i32_38 = arith.constant 0 : i32
      %94 = tpu.memref_slice %arg5[%42, %c5_i32, %c0_i32_38] : memref<2x8x128xf32, #tpu.memory_space<vmem>> -> memref<1x1x128xf32, #tpu.memory_space<vmem>>
      %95 = tpu.memref_squeeze %94 : memref<1x1x128xf32, #tpu.memory_space<vmem>> -> memref<128xf32, #tpu.memory_space<vmem>>
      %96 = tpu.memref_slice %arg6[%42] : memref<2x!tpu.dma_semaphore, #tpu.memory_space<semaphore_mem>> -> memref<1x!tpu.dma_semaphore, #tpu.memory_space<semaphore_mem>>
      %97 = tpu.memref_squeeze %96 : memref<1x!tpu.dma_semaphore, #tpu.memory_space<semaphore_mem>> -> memref<!tpu.dma_semaphore, #tpu.memory_space<semaphore_mem>>
      tpu.enqueue_dma source(%93 : memref<128xf32, #tpu.memory_space<vmem>>) target(%95 : memref<128xf32, #tpu.memory_space<vmem>>) target_semaphore(%97 : memref<!tpu.dma_semaphore, #tpu.memory_space<semaphore_mem>>)
      %c6_i32 = arith.constant 6 : i32
      %98 = arith.addi %43, %c6_i32 : i32
      %99 = arith.index_cast %98 : i32 to index
      %100 = memref.load %arg2[%99] : memref<16xi32, #tpu.memory_space<smem>>
      %c0_i32_39 = arith.constant 0 : i32
      %101 = tpu.memref_slice %arg3[%100, %c0_i32_39] : memref<1000x128xf32, #tpu.memory_space<vmem>> -> memref<1x128xf32, #tpu.memory_space<vmem>>
      %102 = tpu.memref_squeeze %101 : memref<1x128xf32, #tpu.memory_space<vmem>> -> memref<128xf32, #tpu.memory_space<vmem>>
      %c0_i32_40 = arith.constant 0 : i32
      %103 = tpu.memref_slice %arg5[%42, %c6_i32, %c0_i32_40] : memref<2x8x128xf32, #tpu.memory_space<vmem>> -> memref<1x1x128xf32, #tpu.memory_space<vmem>>
      %104 = tpu.memref_squeeze %103 : memref<1x1x128xf32, #tpu.memory_space<vmem>> -> memref<128xf32, #tpu.memory_space<vmem>>
      %105 = tpu.memref_slice %arg6[%42] : memref<2x!tpu.dma_semaphore, #tpu.memory_space<semaphore_mem>> -> memref<1x!tpu.dma_semaphore, #tpu.memory_space<semaphore_mem>>
      %106 = tpu.memref_squeeze %105 : memref<1x!tpu.dma_semaphore, #tpu.memory_space<semaphore_mem>> -> memref<!tpu.dma_semaphore, #tpu.memory_space<semaphore_mem>>
      tpu.enqueue_dma source(%102 : memref<128xf32, #tpu.memory_space<vmem>>) target(%104 : memref<128xf32, #tpu.memory_space<vmem>>) target_semaphore(%106 : memref<!tpu.dma_semaphore, #tpu.memory_space<semaphore_mem>>)
      %c7_i32 = arith.constant 7 : i32
      %107 = arith.addi %43, %c7_i32 : i32
      %108 = arith.index_cast %107 : i32 to index
      %109 = memref.load %arg2[%108] : memref<16xi32, #tpu.memory_space<smem>>
      %c0_i32_41 = arith.constant 0 : i32
      %110 = tpu.memref_slice %arg3[%109, %c0_i32_41] : memref<1000x128xf32, #tpu.memory_space<vmem>> -> memref<1x128xf32, #tpu.memory_space<vmem>>
      %111 = tpu.memref_squeeze %110 : memref<1x128xf32, #tpu.memory_space<vmem>> -> memref<128xf32, #tpu.memory_space<vmem>>
      %c0_i32_42 = arith.constant 0 : i32
      %112 = tpu.memref_slice %arg5[%42, %c7_i32, %c0_i32_42] : memref<2x8x128xf32, #tpu.memory_space<vmem>> -> memref<1x1x128xf32, #tpu.memory_space<vmem>>
      %113 = tpu.memref_squeeze %112 : memref<1x1x128xf32, #tpu.memory_space<vmem>> -> memref<128xf32, #tpu.memory_space<vmem>>
      %114 = tpu.memref_slice %arg6[%42] : memref<2x!tpu.dma_semaphore, #tpu.memory_space<semaphore_mem>> -> memref<1x!tpu.dma_semaphore, #tpu.memory_space<semaphore_mem>>
      %115 = tpu.memref_squeeze %114 : memref<1x!tpu.dma_semaphore, #tpu.memory_space<semaphore_mem>> -> memref<!tpu.dma_semaphore, #tpu.memory_space<semaphore_mem>>
      tpu.enqueue_dma source(%111 : memref<128xf32, #tpu.memory_space<vmem>>) target(%113 : memref<128xf32, #tpu.memory_space<vmem>>) target_semaphore(%115 : memref<!tpu.dma_semaphore, #tpu.memory_space<semaphore_mem>>)
      %c8_i32_43 = arith.constant 8 : i32
    } else {
    }
    %c0_i32_9 = arith.constant 0 : i32
    %c0_i32_10 = arith.constant 0 : i32
    %19 = tpu.memref_slice %arg5[%11, %c0_i32_9, %c0_i32_10] : memref<2x8x128xf32, #tpu.memory_space<vmem>> -> memref<1x8x128xf32, #tpu.memory_space<vmem>>
    %20 = tpu.memref_squeeze %19 : memref<1x8x128xf32, #tpu.memory_space<vmem>> -> memref<8x128xf32, #tpu.memory_space<vmem>>
    %c0_i32_11 = arith.constant 0 : i32
    %c0_i32_12 = arith.constant 0 : i32
    %21 = tpu.memref_slice %arg5[%11, %c0_i32_11, %c0_i32_12] : memref<2x8x128xf32, #tpu.memory_space<vmem>> -> memref<1x8x128xf32, #tpu.memory_space<vmem>>
    %22 = tpu.memref_squeeze %21 : memref<1x8x128xf32, #tpu.memory_space<vmem>> -> memref<8x128xf32, #tpu.memory_space<vmem>>
    %23 = tpu.memref_slice %arg6[%11] : memref<2x!tpu.dma_semaphore, #tpu.memory_space<semaphore_mem>> -> memref<1x!tpu.dma_semaphore, #tpu.memory_space<semaphore_mem>>
    %24 = tpu.memref_squeeze %23 : memref<1x!tpu.dma_semaphore, #tpu.memory_space<semaphore_mem>> -> memref<!tpu.dma_semaphore, #tpu.memory_space<semaphore_mem>>
    tpu.wait_dma2 semaphore(%24 : memref<!tpu.dma_semaphore, #tpu.memory_space<semaphore_mem>>) src(%20 : memref<8x128xf32, #tpu.memory_space<vmem>>) dst(%22 : memref<8x128xf32, #tpu.memory_space<vmem>>)
    %25 = arith.index_cast %11 : i32 to index
    %c0 = arith.constant 0 : index
    %c0_13 = arith.constant 0 : index
    %26 = vector.load %arg5[%25, %c0, %c0_13] : memref<2x8x128xf32, #tpu.memory_space<vmem>>, vector<1x8x128xf32>
    %27 = vector.shape_cast %26 : vector<1x8x128xf32> to vector<8x128xf32>
    %cst = arith.constant 11.3137083 : f32
    %28 = vector.broadcast %cst : f32 to vector<8x128xf32>
    %29 = arith.mulf %27, %28 : vector<8x128xf32>
    %c0_14 = arith.constant 0 : index
    %c0_15 = arith.constant 0 : index
    %30 = vector.load %arg4[%c0_14, %c0_15] : memref<8x128xf32, #tpu.memory_space<vmem>>, vector<8x128xf32>
    tpu.vector_store %arg4[%c0_14, %c0_15], %29 {strides = array<i32>} : memref<8x128xf32, #tpu.memory_space<vmem>>, vector<8x128xf32>,
    return
  }
  func.func @transform_0(%arg0: i32, %arg1: i32, %arg2: memref<16xi32, #tpu.memory_space<smem>>) -> (i32, i32) {
    %c0_i32 = arith.constant 0 : i32
    %c0_i32_0 = arith.constant 0 : i32
    %c0_i32_1 = arith.constant 0 : i32
    return %c0_i32, %c0_i32_0 : i32, i32
  }
  func.func @transform_1(%arg0: i32, %arg1: i32, %arg2: memref<16xi32, #tpu.memory_space<smem>>) -> (i32, i32) {
    %c1_i32 = arith.constant 1 : i32
    %0 = arith.muli %arg0, %c1_i32 : i32
    %1 = arith.addi %0, %arg1 : i32
    %c0_i32 = arith.constant 0 : i32
    %c0_i32_0 = arith.constant 0 : i32
    return %1, %c0_i32 : i32, i32
  }
}

</mosaic_0001>

<bundles_post_ra>
// kernel: tpu_custom_call.1
= control target key start
LH: loop header
LB: loop body
LE: loop exit
PB: predicated region body
PF: predicated region fallthrough
CT: control target
= control target key end

     0   :  { %s1752_s0 = inlined_call_operand.hbm [shape: s32[16], index: 0, kind: input, shape index: {}]   ;;  %s1753_s1 = inlined_call_operand.hbm [shape: f32[1000,128], index: 1, kind: input, shape index: {}]   ;;  %s1754_s2 = inlined_call_operand.hbm [shape: f32[16,128], index: 2, kind: output, shape index: {}]  }
   0x1   :  { %s1427_s11 = scalar_lea.hbm %s1752_s0, 16 }
   0x2   :  { %p1428_p0 = scmp.ne.s32.totalorder %s1752_s0, %s1427_s11  ;;  %p1431_p1 = scmp.lt.u32.totalorder %s1427_s11, %s1752_s0 }
   0x4   :  { %p1433_p2 = pnand %p1431_p1, %p1428_p0 }
   0x6   :  { %1436 = shalt.err (!%p1433_p2)  }
   0x7   :  { %s1553_s16 = smov [#allocation5]  }
   0x8   :  { %8 = dma.hbm_to_smem %s1752_s0, 16, %s1553_s16, [#allocation4] }
   0x9   :  { %1517 = dma.done.wait [#allocation4], 16 }
   0xa   :  { %1518 = vsyncadd [#allocation4], 4294967280 }
   0xb   :  { %10 = sfence }
   0xc   :  { %11 = vsyncpa [#allocation7], 0 }
   0xd   :  { %12 = vsyncpa [#allocation8], 0 }
   0xe   :  { %14 = vsyncpa [#allocation8 + $0x1], 0  ;;  %s1585_s19 = smov 0   ;;  %s1587_s20 = smov 0  }
   0xf   :  { %s1589_s21 = smov 0   ;;  %s1591_s22 = smov 0  }
  0x10   :  { %s1593_s23 = smov 0   ;;  %s1595_s24 = smov 0  }
  0x11 LB: > { %s1297_s0 = sadd.s32 4294967295, %s1551_s24   ;;  %s1298_s25 = sadd.s32 4294967294, %s1551_s24   ;;  %s1551_s24 = sphi %s1595_s24, %s20_s24   ;;  %s1547_s23 = sphi %s1593_s23, %s1772_s23   ;;  %s1543_s22 = sphi %s1591_s22, %s1771_s22   ;;  %s1539_s21 = sphi %s1589_s21, %s1770_s21   ;;  %s1535_s20 = sphi %s1587_s20, %s1769_s20   ;;  %s1531_s19 = sphi %s1585_s19, %s1768_s19  }
  0x12   : > { %s32_s26 = sadd.s32 1, %s1547_s23  ;;  %s62_s27 = sadd.s32 1, %s1539_s21 }
  0x13   : > { %p34_p3 = scmp.ge.s32.totalorder %s32_s26, 2  ;;  %p72_p4 = scmp.ne.s32.totalorder %s1539_s21, %s1535_s20 }
  0x14   : > { %p73_p5 = scmp.eq.s32.totalorder %s1297_s0, 1  ;;  %p78_p6 = scmp.ne.s32.totalorder %s1535_s20, %s1531_s19 }
  0x15   : > { %s1774_s26 = smov (%p34_p3, %s32_s26), 0  ;;  %p79_p8 = scmp.eq.s32.totalorder %s1298_s25, 1 }
  0x16   : > { %p1625_p7 = por %p73_p5, %p72_p4  ;;  %s59_s29 = ssub.s32 %s1547_s23, %s1774_s26 }
  0x17   : > { %p1299_p9 = scmp.ge.s32.totalorder %s1551_s24, 1  ;;  %p60_p10 = scmp.eq.s32.totalorder %s59_s29, 0 }
  0x18   : > { %s1759_s28 = scalar_select %p1625_p7, 1, 0 }
  0x19   : > { %p1632_p11 = por %p79_p8, %p78_p6  ;;  %p86_p12 = scmp.lt.s32.totalorder %s1551_s24, 3 }
  0x1a   : > { %s1638_s3 = scalar_select %p60_p10, %s1539_s21, %s62_s27  }
  0x1b   : > { %s1760_s30 = scalar_select %p1632_p11, 1, 0 }
  0x1c   : > { %p1640_p13 = pnand %p1299_p9, %p86_p12  ;;  %p1644_p0 = scmp.eq.s32.totalorder %s1297_s0, 0 }
  0x1d   : > { %s1554_s6 = smov [#allocation6]   ;;  %s1437_s11 = scalar_lea.hbm %s1753_s1, 16000 }
  0x1e   : > { %s1761_s4 = scalar_select %p1640_p13, 1, 0 }
  0x1f   : > { %s1762_s5 = scalar_select %p1644_p0, 1, 0 }
  0x20   : > { %p1364_p1 = pneg %p1640_p13  ;;  %s98_s7 = sshll.u32 %s1554_s6, 4  ;;  %s99_s7 = int_to_ptr.vmem [resolvable:$true] %s98_s7 }
  0x21   : > { %p1438_p3 = scmp.ne.s32.totalorder %s1753_s1, %s1437_s11  ;;  %p1444_p8 = scmp.lt.u32.totalorder %s1437_s11, %s1753_s1 }
  0x22   : > { %p1652_p2 = pnand %p1644_p0, %p1364_p1 }
  0x24   : > { %p1439_p4 = pneg %p1652_p2 }
  0x26   : > { %p1440_p5 = pnand %p1439_p4, %p1438_p3 }
  0x28   : > { %p1441_p6 = pneg %p1440_p5 }
  0x2a   : > { %p1446_p9 = pnand %p1444_p8, %p1441_p6 }
  0x2c   : > { %1449 = shalt.err (!%p1446_p9)
}
  0x2d   : > { %s1450_s16 = scalar_lea.vmem %s99_s7, 16000  ;;  %p1458_p11 = scmp.lt.s32.totalorder %s99_s7, %s99_s7 }
  0x2e   : > { %p1451_p10 = scmp.ne.s32.totalorder %s99_s7, %s1450_s16  ;;  %p1459_p7 = scmp.lt.s32.totalorder %s1450_s16, %s1450_s16 }
  0x30   : > { %p1453_p12 = pnand %p1451_p10, %p1439_p4  ;;  %p1460_p0 = por %p1459_p7, %p1458_p11 }
  0x32   : > { %p1454_p1 = pneg %p1453_p12 }
  0x34   : > { %p1461_p13 = pnand %p1460_p0, %p1454_p1 }
  0x36   : > { %1464 = shalt.err (!%p1461_p13)
}
  0x37   : > { %s1555_s17 = smov 128   ;;  %s1556_s18 = smov 8  }
  0x38   : > { %1367 = dma.hbm_to_vmem [thread:$0]  (!%p1652_p2), %s1753_s1, 16000, %s99_s7, [#allocation7], %s1555_s17, %s1555_s17, %s1556_s18  }
  0x39   : > { %p1764_p3 = scmp.ne.s32.totalorder %s1761_s4, 0 }
  0x3a   : > { %p1765_p5 = scmp.ne.s32.totalorder (!%p1764_p3), %s1762_s5, 0 }
  0x3b   : > { %114 = sbr.rel (%p1764_p3) target bundleno = 174 (0xae), region = 24 }
  0x42   : > { %1520 = dma.done.wait (%p1765_p5), [#allocation7], 16000  }
  0x43   : > { %1522 = vsyncadd (%p1765_p5), [#allocation7], 4294951296  ;;  %s1679_s27 = sshll.u32 %s1543_s22, 3  ;;  %s126_s29 = sand.u32 1, %s1535_s20  }
  0x44   : > { %s148_s6 = sld [smem:[#allocation5 + %s1679_s27]]  ;;  %s1685_s8 = sshll.u32 %s126_s29, 3 }
  0x45   : > { %s128_s7 = scalar_lea.vmem [#allocation9], %s1685_s8 }
  0x4a   : > { %s149_s4 = scalar_lea.vmem [#allocation6], %s148_s6 }
  0x4b   : > { %v170_v0 = vld [vmem:[%s149_s4] sm:$0x1] }
  0x4c   : > { %171 = vst [vmem:[#allocation2] sm:$0x1] %v170_v0 }
  0x4d   : > { %196 = vsyncadd [#allocation3], 16  ;;  %s197_s5 = sadd.s32 1, %s1679_s27 }
  0x4e   : > { %s198_s9 = sld [smem:[#allocation5 + %s197_s5]] }
  0x54   : > { %s199_s10 = scalar_lea.vmem [#allocation6], %s198_s9 }
  0x55   : > { %v219_v1 = vld [vmem:[%s199_s10] sm:$0x1] }
  0x56   : > { %1306 = vst [vmem:[#allocation2 + $0x1] sm:$0x1] %v219_v1 }
  0x57   : > { %245 = vsyncadd [#allocation3], 16  ;;  %s246_s11 = sadd.s32 2, %s1679_s27 }
  0x58   : > { %s247_s12 = sld [smem:[#allocation5 + %s246_s11]] }
  0x5e   : > { %s248_s13 = scalar_lea.vmem [#allocation6], %s247_s12 }
  0x5f   : > { %v268_v2 = vld [vmem:[%s248_s13] sm:$0x1] }
  0x60   : > { %1308 = vst [vmem:[#allocation2 + $0x2] sm:$0x1] %v268_v2 }
  0x61   : > { %294 = vsyncadd [#allocation3], 16  ;;  %s295_s14 = sadd.s32 3, %s1679_s27 }
  0x62   : > { %s296_s15 = sld [smem:[#allocation5 + %s295_s14]] }
  0x68   : > { %s297_s16 = scalar_lea.vmem [#allocation6], %s296_s15 }
  0x69   : > { %v317_v3 = vld [vmem:[%s297_s16] sm:$0x1] }
  0x6a   : > { %1310 = vst [vmem:[#allocation2 + $0x3] sm:$0x1] %v317_v3 }
  0x6b   : > { %343 = vsyncadd [#allocation3], 16  ;;  %s344_s17 = sadd.s32 4, %s1679_s27 }
  0x6c   : > { %s345_s18 = sld [smem:[#allocation5 + %s344_s17]] }
  0x72   : > { %s346_s0 = scalar_lea.vmem [#allocation6], %s345_s18 }
  0x73   : > { %v366_v4 = vld [vmem:[%s346_s0] sm:$0x1] }
  0x74   : > { %1312 = vst [vmem:[#allocation2 + $0x4] sm:$0x1] %v366_v4 }
  0x75   : > { %392 = vsyncadd [#allocation3], 16  ;;  %s393_s25 = sadd.s32 5, %s1679_s27 }
  0x76   : > { %s394_s6 = sld [smem:[#allocation5 + %s393_s25]] }
  0x7c   : > { %s395_s4 = scalar_lea.vmem [#allocation6], %s394_s6 }
  0x7d   : > { %v415_v5 = vld [vmem:[%s395_s4] sm:$0x1] }
  0x7e   : > { %1314 = vst [vmem:[#allocation2 + $0x5] sm:$0x1] %v415_v5 }
  0x7f   : > { %441 = vsyncadd [#allocation3], 16  ;;  %s442_s5 = sadd.s32 6, %s1679_s27 }
  0x80   : > { %s443_s9 = sld [smem:[#allocation5 + %s442_s5]] }
  0x86   : > { %s444_s10 = scalar_lea.vmem [#allocation6], %s443_s9 }
  0x87   : > { %v464_v6 = vld [vmem:[%s444_s10] sm:$0x1] }
  0x88   : > { %1316 = vst [vmem:[#allocation2 + $0x6] sm:$0x1] %v464_v6 }
  0x89   : > { %490 = vsyncadd [#allocation3], 16  ;;  %s491_s11 = sadd.s32 7, %s1679_s27 }
  0x8a   : > { %s492_s12 = sld [smem:[#allocation5 + %s491_s11]] }
  0x90   : > { %s493_s13 = scalar_lea.vmem [#allocation6], %s492_s12 }
  0x91   : > { %v513_v7 = vld [vmem:[%s493_s13] sm:$0x1] }
  0x92   : > { %1318 = vst [vmem:[#allocation2 + $0x7] sm:$0x1] %v513_v7 }
  0x93   : > { %539 = vsyncadd [#allocation3], 16 }
  0x94   : > { %1523 = dma.done.wait [#allocation3], 128 }
  0x95   : > { %1524 = vsyncadd [#allocation3], 4294967168  ;;  %s1351_s14 = sshll.u32 %s1543_s22, 7  ;;  %s975_s15 = sshll.u32 %s128_s7, 4  ;;  %s1703_s15 = int_to_ptr.vmem [resolvable:$true] %s975_s15 }
  0x96   : > { %s1701_s27 = scalar_lea.hbm %s1754_s2, %s1351_s14  ;;  %s961_s18 = scalar_lea.sflag [#allocation8], %s126_s29 }
  0x97   : > { %s1465_s0 = scalar_lea.vmem %s1703_s15, 128  ;;  %p1766_p11 = scmp.ne.s32.totalorder %s1759_s28, 0 }
  0x98   : > { %p1466_p7 = scmp.ne.s32.totalorder %s1703_s15, %s1465_s0  ;;  %s1557_s22 = smov [#allocation9]  }
  0x99   : > { %v957_v8 = vld [vmem:[#allocation2] sm:$0xff]  ;;  %s1469_s25 = sshll.u32 %s1557_s22, 4  ;;  %s1470_s25 = int_to_ptr.vmem [resolvable:$false] %s1469_s25 }
  0x9a   : > { %v958_v9 = vmul.f32 11.313708, %v957_v8  ;;  %p1467_p13 = pnand %p1466_p7, %p1766_p11  ;;  %s1471_s6 = scalar_lea.vmem %s1470_s25, 256 }
  0x9b   : > { %p1472_p2 = scmp.lt.s32.totalorder %s1703_s15, %s1470_s25  ;;  %p1473_p4 = scmp.lt.s32.totalorder %s1471_s6, %s1465_s0 }
  0x9c   : > { %959 = vst [vmem:[%s128_s7] sm:$0xff] %v958_v9  ;;  %p1468_p0 = pneg %p1467_p13 }
  0x9d   : > { %p1474_p6 = por %p1473_p4, %p1472_p2 }
  0x9f   : > { %p1475_p8 = pnand %p1474_p6, %p1468_p0 }
  0xa1   : > { %1478 = shalt.err (!%p1475_p8)
}
  0xa2   : > { %s1479_s29 = scalar_lea.hbm %s1701_s27, 128  ;;  %s1483_s4 = scalar_lea.hbm %s1754_s2, 256 }
  0xa3   : > { %p1480_p9 = scmp.ne.s32.totalorder %s1701_s27, %s1479_s29  ;;  %p1484_p1 = scmp.lt.u32.totalorder %s1701_s27, %s1754_s2 }
  0xa4   : > { %p1485_p3 = scmp.lt.u32.totalorder %s1483_s4, %s1479_s29  ;;  %p1487_p7 = scmp.lt.u32.totalorder %s1479_s29, %s1701_s27 }
  0xa5   : > { %p1481_p10 = pnand %p1480_p9, %p1766_p11 }
  0xa6   : > { %p1486_p5 = por %p1485_p3, %p1484_p1 }
  0xa7   : > { %p1482_p12 = pneg %p1481_p10 }
  0xa8   : > { %p1488_p13 = por %p1487_p7, %p1486_p5 }
  0xaa   : > { %p1489_p0 = pnand %p1488_p13, %p1482_p12 }
  0xac   : > { %1492 = shalt.err (!%p1489_p0)
}
  0xad   : > { %1362 = dma.vmem_to_hbm [thread:$0]  (%p1766_p11), %s1703_s15, 128, %s1701_s27, %s961_s18  }
  0xae PF: > { %p1374_p2 = scmp.ge.s32.totalorder %s1551_s24, 2  ;;  %s987_s10 = sand.u32 1, %s1531_s19  }
  0xaf   : > { %p1767_p4 = scmp.ne.s32.totalorder %s1760_s30, 0  ;;  %s988_s11 = scalar_lea.sflag [#allocation8], %s987_s10 }
  0xb1   : > { %p1369_p6 = pnand %p1374_p2, %p1767_p4 }
  0xb3   : > { %1526 = dma.done.wait (!%p1369_p6), %s988_s11, 128  }
  0xb4   : > { %1528 = vsyncadd (!%p1369_p6), %s988_s11, 4294967168  ;;  %s20_s24 = sadd.s32 1, %s1551_s24   ;;  %s1768_s19 = smov %s1535_s20 }
  0xb5   : > { %p17_p8 = scmp.ge.s32.totalorder %s20_s24, 4   ;;  %s1769_s20 = smov %s1539_s21 }
  0xb6   : > { %s1770_s21 = smov %s1638_s3  ;;  %s1771_s22 = smov %s1547_s23 }
  0xb7   : > { %s1772_s23 = smov %s1774_s26  ;;  %19 = sbr.rel (!%p17_p8) target bundleno = 17 (0x11), region = 746 }
  0xbe   :  { %993 = vsyncpa [#allocation7], 1 }
  0xbf   :  { %995 = vsyncpa [#allocation7 + $0x1], 1 }
  0xc0   :  { %996 = vsyncpa [#allocation8], 1 }
  0xc1   :  { %998 = vsyncpa [#allocation8 + $0x1], 1 }
  0xc2   :  { %999 = vsyncmov [#allocation3] }
  0xc5   :  { %s1000_s28 = vpop.sfrf %999 }
  0xc6   :  { %p1354_p11 = scmp.ne.s32.totalorder %s1000_s28, 0 }
  0xc8   :  { %1004 = shalt.err (%p1354_p11)  }
  0xc9   :  { %1006 = vsyncmov [#allocation3 + $0x1] }
  0xcc   :  { %s1007_s30 = vpop.sfrf %1006 }
  0xcd   :  { %p1355_p9 = scmp.ne.s32.totalorder %s1007_s30, 0 }
  0xcf   :  { %1011 = shalt.err (%p1355_p9)  }

</bundles_post_ra>
